<compile_context>
chip_gen: v5e
topology: v5e:2x2
jax: 0.10.0
libtpu: 0.0.40
codegen_flags: <defaults>
</compile_context>

<pallas_src>
import numpy as np
import jax
import jax.numpy as jnp
from jax.experimental import pallas as pl
from jax.experimental.pallas import tpu as pltpu

_PAD = 2  # 'same' padding for a 5x5 kernel with stride 1


# ---------------------------------------------------------------------------
# Deterministic SRM filter weights (exactly as in the PyTorch __init__),
# used only by the plain-JAX reference below.
# ---------------------------------------------------------------------------
def _srm_filters() -> np.ndarray:
    q = [4.0, 12.0, 2.0]
    filter1 = [[0, 0, 0, 0, 0],
               [0, -1, 2, -1, 0],
               [0, 2, -4, 2, 0],
               [0, -1, 2, -1, 0],
               [0, 0, 0, 0, 0]]
    filter2 = [[-1, 2, -2, 2, -1],
               [2, -6, 8, -6, 2],
               [-2, 8, -12, 8, -2],
               [2, -6, 8, -6, 2],
               [-1, 2, -2, 2, -1]]
    filter3 = [[0, 0, 0, 0, 0],
               [0, 0, 0, 0, 0],
               [0, 1, -2, 1, 0],
               [0, 0, 0, 0, 0],
               [0, 0, 0, 0, 0]]
    f1 = np.asarray(filter1, dtype=np.float64) / q[0]
    f2 = np.asarray(filter2, dtype=np.float64) / q[1]
    f3 = np.asarray(filter3, dtype=np.float64) / q[2]
    filters = np.asarray([[f1, f1, f1], [f2, f2, f2], [f3, f3, f3]])
    return filters.astype(np.float32)   # (out=3, in=3, 5, 5)


_FILTERS = _srm_filters()


# ---------------------------------------------------------------------------
# Pallas kernel: one grid step = one batch element, all 3 output channels.
#   sp_ref: (H+4, W+4)  zero-padded channel-sum image (VMEM)
#   o_ref:  (3, H, W)   output tile (VMEM)
# ---------------------------------------------------------------------------
def _srm_kernel(sp_ref, o_ref):
    H = o_ref.shape[1]
    W = o_ref.shape[2]

    sp = sp_ref[...]                                   # single full VMEM load

    # Horizontal 3-tap pass v = [1,-2,1]; the three lane-shifted views of sp are
    # built exactly once and shared by every filter / vertical pass.
    aw = sp[:, 0:W + 2] - 2.0 * sp[:, 1:W + 3] + sp[:, 2:W + 4]   # (H+4, W+2)
    a = aw[:, 1:W + 1]                       # Hv(s), centered         (H+4, W)
    b = aw[:, 0:W] + aw[:, 2:W + 2]          # Hu(s), u=[1,-2,2,-2,1]  (H+4, W)

    # Vertical passes (sublane-shifted views, each built once).
    vv = a[1:H + 1, :] - 2.0 * a[2:H + 2, :] + a[3:H + 3, :]      # Vv(Hv(s)) (H, W)
    c = b[0:H + 2, :] - 2.0 * b[1:H + 3, :] + b[2:H + 4, :]       # Vv(Hu(s)) (H+2, W)
    vu = c[0:H, :] + c[2:H + 2, :]                                # Vu(Hu(s)) (H, W)

    # f1 = -(1/4) v(x)v ; f2 = -(1/12) u(x)u - (1/6) v(x)v ; f3 = (1/2) row(x)v
    o_ref[0] = (-0.25) * vv
    o_ref[1] = (-1.0 / 12.0) * vu + (-1.0 / 6.0) * vv
    o_ref[2] = 0.5 * a[2:H + 2, :]


@jax.jit
def srm_conv(x: jax.Array) -> jax.Array:
    """SRM 5x5 conv, 'same' padding, NCHW, float32. x: (N, 3, H, W)."""
    N, C, H, W = x.shape
    assert C == 3, "SRMConv expects 3 input channels"
    x = x.astype(jnp.float32)

    # Channel-sum + halo pad fused into one small XLA pre-pass (every output
    # channel convolves all input channels with the same filter, so only the
    # sum of the channels is ever needed by the kernel).
    s = x[:, 0] + x[:, 1] + x[:, 2]                          # (N, H, W)
    sp = jnp.pad(s, ((0, 0), (_PAD, _PAD), (_PAD, _PAD)))    # (N, H+4, W+4)
    Hp, Wp = H + 2 * _PAD, W + 2 * _PAD

    # VMEM budget from the actual block footprint:
    # double-buffered input + output blocks + elementwise temporaries + slack.
    in_block = Hp * Wp * 4
    out_block = 3 * H * W * 4
    temps = 8 * Hp * (W + 2) * 4
    est = 2 * in_block + 2 * out_block + temps + (4 << 20)
    vmem_limit = int(min(64 << 20, max(32 << 20, est)))

    return pl.pallas_call(
        _srm_kernel,
        out_shape=jax.ShapeDtypeStruct((N, 3, H, W), jnp.float32),
        grid_spec=pltpu.PrefetchScalarGridSpec(
            num_scalar_prefetch=0,
            grid=(N,),
            in_specs=[
                # leading size-1 batch dim squeezed out of the kernel ref
                pl.BlockSpec((None, Hp, Wp), lambda n: (n, 0, 0)),
            ],
            out_specs=pl.BlockSpec((None, 3, H, W), lambda n: (n, 0, 0, 0)),
        ),
        compiler_params=pltpu.CompilerParams(
            dimension_semantics=("parallel",),
            vmem_limit_bytes=vmem_limit,
        ),
    )(sp)


# ---------------------------------------------------------------------------
# Reference in plain JAX (mirrors torch.nn.Conv2d with the SRM weights).
# ---------------------------------------------------------------------------
def srm_conv_ref(x: jax.Array) -> jax.Array:
    w = jnp.asarray(_FILTERS)  # (O, I, KH, KW)
    return jax.lax.conv_general_dilated(
        x.astype(jnp.float32), w,
        window_strides=(1, 1),
        padding="SAME",
        dimension_numbers=("NCHW", "OIHW", "NCHW"),
    )


if __name__ == "__main__":
    key = jax.random.PRNGKey(0)
    x = jax.random.normal(key, (2, 3, 16, 16), dtype=jnp.float32)

    out = jax.block_until_ready(srm_conv(x))
    ref = jax.block_until_ready(srm_conv_ref(x))

    assert out.shape == (2, 3, 16, 16)
    assert np.allclose(np.asarray(out), np.asarray(ref), atol=1e-4, rtol=1e-4)

    print("KERNEL_OK")
</pallas_src>

<mosaic_0001>
module attributes {stable_mosaic.version = 11 : i64} {
  func.func @_srm_kernel(%arg0: i32, %arg1: memref<1x20x20xf32, #tpu.memory_space<vmem>>, %arg2: memref<1x3x16x16xf32, #tpu.memory_space<vmem>>) attributes {dimension_semantics = [#tpu.dimension_semantics<parallel>], iteration_bounds = array<i64: 2>, scalar_prefetch = 0 : i64, scratch_operands = 0 : i64, tpu.core_type = #tpu.core_type<tc>, window_params = [{transform_indices = @transform_0, window_bounds = array<i64: 1, 20, 20>}, {transform_indices = @transform_1, window_bounds = array<i64: 1, 3, 16, 16>}]} {
    %c0 = arith.constant 0 : index
    %c0_0 = arith.constant 0 : index
    %c0_1 = arith.constant 0 : index
    %0 = vector.load %arg1[%c0, %c0_0, %c0_1] : memref<1x20x20xf32, #tpu.memory_space<vmem>>, vector<1x20x20xf32>
    %1 = vector.shape_cast %0 : vector<1x20x20xf32> to vector<20x20xf32>
    %2 = vector.extract_strided_slice %1 {offsets = [0, 0], sizes = [20, 18], strides = [1, 1]} : vector<20x20xf32> to vector<20x18xf32>
    %3 = vector.extract_strided_slice %1 {offsets = [0, 1], sizes = [20, 18], strides = [1, 1]} : vector<20x20xf32> to vector<20x18xf32>
    %cst = arith.constant 2.000000e+00 : f32
    %4 = vector.broadcast %cst : f32 to vector<20x18xf32>
    %5 = arith.mulf %4, %3 : vector<20x18xf32>
    %6 = arith.subf %2, %5 : vector<20x18xf32>
    %7 = vector.extract_strided_slice %1 {offsets = [0, 2], sizes = [20, 18], strides = [1, 1]} : vector<20x20xf32> to vector<20x18xf32>
    %8 = arith.addf %6, %7 : vector<20x18xf32>
    %9 = vector.extract_strided_slice %8 {offsets = [0, 1], sizes = [20, 16], strides = [1, 1]} : vector<20x18xf32> to vector<20x16xf32>
    %10 = vector.extract_strided_slice %8 {offsets = [0, 0], sizes = [20, 16], strides = [1, 1]} : vector<20x18xf32> to vector<20x16xf32>
    %11 = vector.extract_strided_slice %8 {offsets = [0, 2], sizes = [20, 16], strides = [1, 1]} : vector<20x18xf32> to vector<20x16xf32>
    %12 = arith.addf %10, %11 : vector<20x16xf32>
    %13 = vector.extract_strided_slice %9 {offsets = [1, 0], sizes = [16, 16], strides = [1, 1]} : vector<20x16xf32> to vector<16x16xf32>
    %14 = vector.extract_strided_slice %9 {offsets = [2, 0], sizes = [16, 16], strides = [1, 1]} : vector<20x16xf32> to vector<16x16xf32>
    %cst_2 = arith.constant 2.000000e+00 : f32
    %15 = vector.broadcast %cst_2 : f32 to vector<16x16xf32>
    %16 = arith.mulf %15, %14 : vector<16x16xf32>
    %17 = arith.subf %13, %16 : vector<16x16xf32>
    %18 = vector.extract_strided_slice %9 {offsets = [3, 0], sizes = [16, 16], strides = [1, 1]} : vector<20x16xf32> to vector<16x16xf32>
    %19 = arith.addf %17, %18 : vector<16x16xf32>
    %20 = vector.extract_strided_slice %12 {offsets = [0, 0], sizes = [18, 16], strides = [1, 1]} : vector<20x16xf32> to vector<18x16xf32>
    %21 = vector.extract_strided_slice %12 {offsets = [1, 0], sizes = [18, 16], strides = [1, 1]} : vector<20x16xf32> to vector<18x16xf32>
    %cst_3 = arith.constant 2.000000e+00 : f32
    %22 = vector.broadcast %cst_3 : f32 to vector<18x16xf32>
    %23 = arith.mulf %22, %21 : vector<18x16xf32>
    %24 = arith.subf %20, %23 : vector<18x16xf32>
    %25 = vector.extract_strided_slice %12 {offsets = [2, 0], sizes = [18, 16], strides = [1, 1]} : vector<20x16xf32> to vector<18x16xf32>
    %26 = arith.addf %24, %25 : vector<18x16xf32>
    %27 = vector.extract_strided_slice %26 {offsets = [0, 0], sizes = [16, 16], strides = [1, 1]} : vector<18x16xf32> to vector<16x16xf32>
    %28 = vector.extract_strided_slice %26 {offsets = [2, 0], sizes = [16, 16], strides = [1, 1]} : vector<18x16xf32> to vector<16x16xf32>
    %29 = arith.addf %27, %28 : vector<16x16xf32>
    %cst_4 = arith.constant -2.500000e-01 : f32
    %30 = vector.broadcast %cst_4 : f32 to vector<16x16xf32>
    %31 = arith.mulf %30, %19 : vector<16x16xf32>
    %c0_5 = arith.constant 0 : index
    %c0_6 = arith.constant 0 : index
    %c0_7 = arith.constant 0 : index
    %c0_8 = arith.constant 0 : index
    %32 = vector.load %arg2[%c0_5, %c0_6, %c0_7, %c0_8] : memref<1x3x16x16xf32, #tpu.memory_space<vmem>>, vector<1x1x16x16xf32>
    %33 = vector.shape_cast %32 : vector<1x1x16x16xf32> to vector<16x16xf32>
    %34 = vector.shape_cast %31 : vector<16x16xf32> to vector<1x1x16x16xf32>
    tpu.vector_store %arg2[%c0_5, %c0_6, %c0_7, %c0_8], %34 {strides = array<i32>} : memref<1x3x16x16xf32, #tpu.memory_space<vmem>>, vector<1x1x16x16xf32>,
    %cst_9 = arith.constant -0.0833333358 : f32
    %35 = vector.broadcast %cst_9 : f32 to vector<16x16xf32>
    %36 = arith.mulf %35, %29 : vector<16x16xf32>
    %cst_10 = arith.constant -0.166666672 : f32
    %37 = vector.broadcast %cst_10 : f32 to vector<16x16xf32>
    %38 = arith.mulf %37, %19 : vector<16x16xf32>
    %39 = arith.addf %36, %38 : vector<16x16xf32>
    %c0_11 = arith.constant 0 : index
    %c1 = arith.constant 1 : index
    %c0_12 = arith.constant 0 : index
    %c0_13 = arith.constant 0 : index
    %40 = vector.load %arg2[%c0_11, %c1, %c0_12, %c0_13] : memref<1x3x16x16xf32, #tpu.memory_space<vmem>>, vector<1x1x16x16xf32>
    %41 = vector.shape_cast %40 : vector<1x1x16x16xf32> to vector<16x16xf32>
    %42 = vector.shape_cast %39 : vector<16x16xf32> to vector<1x1x16x16xf32>
    tpu.vector_store %arg2[%c0_11, %c1, %c0_12, %c0_13], %42 {strides = array<i32>} : memref<1x3x16x16xf32, #tpu.memory_space<vmem>>, vector<1x1x16x16xf32>,
    %43 = vector.extract_strided_slice %9 {offsets = [2, 0], sizes = [16, 16], strides = [1, 1]} : vector<20x16xf32> to vector<16x16xf32>
    %cst_14 = arith.constant 5.000000e-01 : f32
    %44 = vector.broadcast %cst_14 : f32 to vector<16x16xf32>
    %45 = arith.mulf %44, %43 : vector<16x16xf32>
    %c0_15 = arith.constant 0 : index
    %c2 = arith.constant 2 : index
    %c0_16 = arith.constant 0 : index
    %c0_17 = arith.constant 0 : index
    %46 = vector.load %arg2[%c0_15, %c2, %c0_16, %c0_17] : memref<1x3x16x16xf32, #tpu.memory_space<vmem>>, vector<1x1x16x16xf32>
    %47 = vector.shape_cast %46 : vector<1x1x16x16xf32> to vector<16x16xf32>
    %48 = vector.shape_cast %45 : vector<16x16xf32> to vector<1x1x16x16xf32>
    tpu.vector_store %arg2[%c0_15, %c2, %c0_16, %c0_17], %48 {strides = array<i32>} : memref<1x3x16x16xf32, #tpu.memory_space<vmem>>, vector<1x1x16x16xf32>,
    return
  }
  func.func @transform_0(%arg0: i32) -> (i32, i32, i32) {
    %c0_i32 = arith.constant 0 : i32
    %c0_i32_0 = arith.constant 0 : i32
    %c0_i32_1 = arith.constant 0 : i32
    return %arg0, %c0_i32, %c0_i32_0 : i32, i32, i32
  }
  func.func @transform_1(%arg0: i32) -> (i32, i32, i32, i32) {
    %c0_i32 = arith.constant 0 : i32
    %c0_i32_0 = arith.constant 0 : i32
    %c0_i32_1 = arith.constant 0 : i32
    %c0_i32_2 = arith.constant 0 : i32
    return %arg0, %c0_i32, %c0_i32_0, %c0_i32_1 : i32, i32, i32, i32
  }
}

</mosaic_0001>

<bundles_post_ra>
// kernel: srm_conv.1
= control target key start
LH: loop header
LB: loop body
LE: loop exit
PB: predicated region body
PF: predicated region fallthrough
CT: control target
= control target key end

     0   :  { %6 = vsyncpa [#allocation3], 0  ;;  %s647_s0 = inlined_call_operand.vmem [shape: f32[2,20,20], index: 0, kind: input, shape index: {}]   ;;  %s648_s1 = inlined_call_operand.hbm [shape: f32[2,3,16,16], index: 1, kind: output, shape index: {}]  }
   0x1   :  { %8 = vsyncpa [#allocation3 + $0x1], 0  ;;  %s520_s6 = smov 0   ;;  %s522_s7 = smov 0  }
   0x2   :  { %s524_s8 = smov 0   ;;  %s526_s9 = smov 0  }
   0x3 LB: > { %s541_s10 = sadd.s32 4294967295, %s504_s9   ;;  %s383_s11 = sadd.s32 4294967294, %s504_s9   ;;  %s504_s9 = sphi %s526_s9, %s654_s9   ;;  %s500_s8 = sphi %s524_s8, %s653_s8   ;;  %s496_s7 = sphi %s522_s7, %s652_s7   ;;  %s492_s6 = sphi %s520_s6, %s651_s6  }
   0x4   : > { %s545_s12 = sadd.s32 1, %s504_s9   ;;  %s47_s13 = sadd.s32 1, %s500_s8 }
   0x5   : > { %s44_s14 = ssub.s32 %s504_s9, %s545_s12  ;;  %p57_p0 = scmp.ne.s32.totalorder %s500_s8, %s496_s7 }
   0x6   : > { %p45_p1 = scmp.eq.s32.totalorder %s44_s14, 0  ;;  %p58_p2 = scmp.eq.s32.totalorder %s541_s10, 1 }
   0x7   : > { %p63_p3 = scmp.ne.s32.totalorder %s496_s7, %s492_s6  ;;  %p64_p4 = scmp.eq.s32.totalorder %s383_s11, 1 }
   0x8   : > { %s556_s15 = scalar_select %p45_p1, %s500_s8, %s47_s13  }
   0x9   : > { %p558_p5 = por %p58_p2, %p57_p0  ;;  %p562_p6 = por %p64_p4, %p63_p3 }
   0xa   : > { %p386_p7 = scmp.ge.s32.totalorder %s504_s9, 1  ;;  %p90_p8 = scmp.lt.s32.totalorder %s504_s9, 3 }
   0xc   : > { %p91_p9 = pnand %p386_p7, %p90_p8 }
   0xd   : > { %p110_p10 = scmp.lt.s32.totalorder (!%p91_p9), %s541_s10, 1  ;;  %s506_s23 = smov (!%p91_p9), 126  }
   0xe   : > { %94 = sbr.rel (%p91_p9) target bundleno = 300 (0x12c), region = 24  ;;  %s507_s24 = smov (!%p91_p9), 127  }
   0xf   : > { %s107_s25 = sand.u32 (!%p91_p9), 1, %s496_s7   ;;  %s398_s28 = smul.u32 (!%p91_p9), 48, %s541_s10 }
  0x10   : > { %s396_s26 = smul.u32 (!%p91_p9), 48, %s107_s25  ;;  %s306_s5 = scalar_lea.sflag (!%p91_p9), [#allocation3], %s107_s25 }
  0x11   : > { %s317_s2 = scalar_lea.hbm (!%p91_p9), %s648_s1, %s398_s28 }
  0x12   : > { %s593_s27 = scalar_lea.vmem (!%p91_p9), [#allocation2], %s396_s26  ;;  %s320_s4 = sshll.u32 (!%p91_p9), %s317_s2, 4  ;;  %s321_s4 = int_to_ptr.hbm [resolvable:$true] %s320_s4 }
  0x13   : > { %s111_s18 = scalar_select %p110_p10, %s541_s10, 1  ;;  %vm172_vm0 = vcmask 1046528   ;;  %vm184_vm1 = vcmask 1045504   ;;  %vm254_vm2 = vcmask 130049   ;;  %vm300_vm3 = vcmask 130050  }
  0x14   : > { %vm258_vm4 = vcmask 122880   ;;  %vm256_vm5 = vcmask 130048   ;;  %vm303_vm6 = vcmask 123904   ;;  %s318_s3 = sshll.u32 %s593_s27, 4  ;;  %s456_s10 = sshra.s32 %s321_s4, 4  ;;  %s319_s3 = int_to_ptr.vmem [resolvable:$true] %s318_s3  ;;  %s457_s10 = int_to_ptr.hbm [resolvable:$true] %s456_s10 }
  0x15   : > { %s397_s19 = smul.u32 24, %s111_s18  ;;  %s458_s11 = scalar_lea.hbm %s457_s10, 48 }
  0x16   : > { %p459_p11 = scmp.ne.s32.totalorder %s457_s10, %s458_s11  ;;  %s462_s18 = scalar_lea.hbm %s648_s1, 96 }
  0x17   : > { %s114_s22 = scalar_lea.vmem %s647_s0, %s397_s19  ;;  %p463_p0 = scmp.lt.s32.totalorder %s457_s10, %s648_s1 }
  0x18   : > { %v117_v0 = vld [vmem:[%s114_s22 + $0x10] sm:$0xf]  ;;  %v115_v1 = vld [vmem:[%s114_s22] sm:$0xff]  ;;  %v116_v2 = vld [vmem:[%s114_s22 + $0x8] sm:$0xff]  ;;  %p460_p12 = pnand %p459_p11, %p558_p5  ;;  %p464_p1 = scmp.lt.s32.totalorder %s462_s18, %s458_s11 }
  0x19   : > { %v120_v3 = vmul.f32 2.0, %v117_v0  ;;  %v118_v4 = vmul.f32 2.0, %v115_v1  ;;  %141 = vrot.lane.b32.xlu2 %v116_v2, %s506_s23  ;;  %v119_v5 = vmul.f32 2.0, %v116_v2 }
  0x1a   : > { %p461_p13 = pneg %p460_p12  ;;  %p465_p2 = por %p464_p1, %p463_p0 }
  0x1b   : > { %128 = vrot.lane.b32.xlu1 %v120_v3, %s507_s24  ;;  %124 = vrot.lane.b32.xlu0 %v118_v4, %s507_s24 }
  0x1c   : > { %p466_p3 = pnand %p465_p2, %p461_p13 }
  0x21   : > { %143 = vrot.lane.b32.xlu2 %v117_v0, %s506_s23 }
  0x23   : > { %139 = vrot.lane.b32.xlu1 %v115_v1, %s506_s23  ;;  %126 = vrot.lane.b32.xlu0 %v119_v5, %s507_s24 }
  0x73   : > { %v142_v6 = vpop.permute.xlu2 %141 }
  0x7b   : > { %v144_v7 = vpop.permute.xlu2 %143 }
  0x8d   : > { %v129_v8 = vpop.permute.xlu1 %128  ;;  %v125_v9 = vpop.permute.xlu0 %124 }
  0x8e   : > { %v135_v10 = vsub.f32 %v117_v0, %v129_v8  ;;  %v133_v13 = vsub.f32 %v115_v1, %v125_v9 }
  0x90   : > { %v150_v11 = vadd.f32 %v144_v7, %v135_v10 }
  0x92   : > { %158 = vrot.lane.b32.xlu2 %v150_v11, %s506_s23  ;;  %v168_v12 = vmul.f32 2.0, %v150_v11  ;;  %v188_v21 = vrot.slane %v150_v11, 2  ;;  %v286_v49 = vmul.f32 0.5, %v150_v11 }
  0x94   : > { %v176_v14 = vrot.slane %v168_v12, 1 }
  0x95   : > { %v140_v15 = vpop.permute.xlu1 %139  ;;  %v127_v16 = vpop.permute.xlu0 %126 }
  0x96   : > { %v148_v17 = vadd.f32 %v140_v15, %v133_v13  ;;  %v134_v18 = vsub.f32 %v116_v2, %v127_v16  ;;  %v183_v20 = vsub.f32 %v150_v11, %v176_v14 }
  0x98   : > { %v149_v19 = vadd.f32 %v142_v6, %v134_v18  ;;  %154 = vrot.lane.b32.xlu0 %v148_v17, %s506_s23  ;;  %v166_v22 = vmul.f32 2.0, %v148_v17  ;;  %v195_v24 = vadd.f32 %v188_v21, %v183_v20  ;;  %v185_v30 = vrot.slane %v148_v17, 2 }
  0x99   : > { %v284_v47 = vmul.f32 0.5, %v148_v17 }
  0x9a   : > { %156 = vrot.lane.b32.xlu1 %v149_v19, %s506_s23  ;;  %v167_v23 = vmul.f32 2.0, %v149_v19  ;;  %v186_v26 = vrot.slane %v149_v19, 2  ;;  %v173_v27 = vrot.slane %v166_v22, 1  ;;  %v241_v33 = vmul.f32 -0.25, %v195_v24 }
  0x9b   : > { %v264_v41 = vmul.f32 -0.16666667, %v195_v24  ;;  %v285_v50 = vmul.f32 0.5, %v149_v19 }
  0x9c   : > { %v174_v25 = vrot.slane %v167_v23, 1  ;;  %v189_v34 = vsel %vm184_vm1, %v186_v26, %v188_v21  ;;  %v187_v35 = vsel %vm184_vm1, %v185_v30, %v186_v26 }
  0x9d   : > { %v271_v44 = vrot.slane %v264_v41, 1 }
  0x9e   : > { %v177_v28 = vsel %vm172_vm0, %v174_v25, %v176_v14  ;;  %v175_v29 = vsel %vm172_vm0, %v173_v27, %v174_v25 }
  0x9f   : > { %v182_v31 = vsub.f32 %v149_v19, %v177_v28  ;;  %v181_v32 = vsub.f32 %v148_v17, %v175_v29 }
  0xa1   : > { %v194_v36 = vadd.f32 %v189_v34, %v182_v31  ;;  %v193_v37 = vadd.f32 %v187_v35, %v181_v32 }
  0xa2   : > { %249 = vrot.lane.b32.xlu1 %v241_v33, %s507_s24 }
  0xa3   : > { %v240_v38 = vmul.f32 -0.25, %v194_v36  ;;  %v239_v39 = vmul.f32 -0.25, %v193_v37  ;;  %v263_v40 = vmul.f32 -0.16666667, %v194_v36  ;;  %v262_v42 = vmul.f32 -0.16666667, %v193_v37 }
  0xa5   : > { %247 = vrot.lane.b32.xlu0 %v240_v38, %s507_s24  ;;  %245 = vrot.lane.b32.xlu2 %v239_v39, %s507_s24  ;;  %v269_v43 = vrot.slane %v263_v40, 1  ;;  %v268_v45 = vrot.slane %v262_v42, 1 }
  0xa7   : > { %v272_v46 = vsel %vm172_vm0, %v269_v43, %v271_v44  ;;  %v270_v48 = vsel %vm172_vm0, %v268_v45, %v269_v43 }
  0xaa   : > { %275 = vrot.lane.b32.xlu1 %v272_v46, %s507_s24 }
  0xad   : > { %273 = vrot.lane.b32.xlu0 %v270_v48, %s507_s24  ;;  %290 = vrot.lane.b32.xlu2 %v284_v47, %s507_s24 }
  0xb2   : > { %294 = vrot.lane.b32.xlu1 %v286_v49, %s507_s24 }
  0xb5   : > { %292 = vrot.lane.b32.xlu0 %v285_v50, %s507_s24 }
  0xec   : > { %v159_v51 = vpop.permute.xlu2 %158 }
  0xed   : > { %v165_v53 = vadd.f32 %v159_v51, %v150_v11 }
  0xef   : > { %v198_v55 = vmul.f32 2.0, %v165_v53  ;;  %v219_v3 = vrot.slane %v165_v53, 2 }
  0xf1   : > { %v205_v58 = vrot.slane %v198_v55, 1 }
  0xf3   : > { %v212_v63 = vsub.f32 %v165_v53, %v205_v58 }
  0xf5   : > { %v226_v7 = vadd.f32 %v219_v3, %v212_v63 }
  0xf7   : > { %v233_v16 = vrot.slane %v226_v7, 2 }
  0xff   : > { %v246_v52 = vpop.permute.xlu2 %245 }
 0x100   : > { %255 = vst.msk [vmem:[%s593_s27 - $0x1] sm:$0xfe] %vm254_vm2, %v246_v52 }
 0x107   : > { %v291_v54 = vpop.permute.xlu2 %290 }
 0x108   : > { %390 = vst.msk [vmem:[%s593_s27 + $0x1e] sm:$0xfc] %vm300_vm3, %v291_v54 }
 0x10a   : > { %v155_v56 = vpop.permute.xlu0 %154 }
 0x10b   : > { %v163_v57 = vadd.f32 %v155_v56, %v148_v17 }
 0x10c   : > { %v157_v59 = vpop.permute.xlu1 %156 }
 0x10d   : > { %v196_v60 = vmul.f32 2.0, %v163_v57  ;;  %v164_v61 = vadd.f32 %v157_v59, %v149_v19  ;;  %v216_v4 = vrot.slane %v163_v57, 2 }
 0x10f   : > { %v197_v62 = vmul.f32 2.0, %v164_v61  ;;  %v202_v0 = vrot.slane %v196_v60, 1  ;;  %v217_v2 = vrot.slane %v164_v61, 2 }
 0x111   : > { %v203_v1 = vrot.slane %v197_v62, 1  ;;  %v220_v11 = vsel %vm184_vm1, %v217_v2, %v219_v3  ;;  %v218_v12 = vsel %vm184_vm1, %v216_v4, %v217_v2 }
 0x113   : > { %v206_v5 = vsel %vm172_vm0, %v203_v1, %v205_v58  ;;  %v204_v6 = vsel %vm172_vm0, %v202_v0, %v203_v1 }
 0x114   : > { %v211_v8 = vsub.f32 %v164_v61, %v206_v5  ;;  %v250_v9 = vpop.permute.xlu1 %249  ;;  %v210_v10 = vsub.f32 %v163_v57, %v204_v6 }
 0x115   : > { %259 = vst.msk [vmem:[%s593_s27 + $0xf] sm:$0x1] %vm258_vm4, %v250_v9 }
 0x116   : > { %v225_v13 = vadd.f32 %v220_v11, %v211_v8  ;;  %v224_v14 = vadd.f32 %v218_v12, %v210_v10 }
 0x117   : > { %v248_v15 = vpop.permute.xlu0 %247 }
 0x118   : > { %257 = vst.msk [vmem:[%s593_s27 + $0x7] sm:$0xff] %vm256_vm5, %v248_v15  ;;  %v231_v17 = vrot.slane %v225_v13, 2  ;;  %v230_v18 = vrot.slane %v224_v14, 2 }
 0x11a   : > { %v234_v19 = vsel %vm184_vm1, %v231_v17, %v233_v16  ;;  %v232_v20 = vsel %vm184_vm1, %v230_v18, %v231_v17 }
 0x11b   : > { %v238_v21 = vadd.f32 %v234_v19, %v225_v13  ;;  %v237_v22 = vadd.f32 %v232_v20, %v224_v14 }
 0x11c   : > { %v276_v23 = vpop.permute.xlu1 %275 }
 0x11d   : > { %v261_v24 = vmul.f32 -0.083333336, %v238_v21  ;;  %v260_v25 = vmul.f32 -0.083333336, %v237_v22 }
 0x11f   : > { %v280_v26 = vadd.f32 %v276_v23, %v261_v24  ;;  %v274_v27 = vpop.permute.xlu0 %273 }
 0x120   : > { %v279_v28 = vadd.f32 %v274_v27, %v260_v25 }
 0x121   : > { %389 = vst.msk [vmem:[%s593_s27 + $0x18] sm:$0xff] %vm256_vm5, %v280_v26 }
 0x122   : > { %388 = vst.msk [vmem:[%s593_s27 + $0x10] sm:$0xff] %vm256_vm5, %v279_v28 }
 0x124   : > { %v295_v29 = vpop.permute.xlu1 %294 }
 0x125   : > { %392 = vst.msk [vmem:[%s593_s27 + $0x2e] sm:$0x3] %vm303_vm6, %v295_v29 }
 0x127   : > { %v293_v30 = vpop.permute.xlu0 %292 }
 0x128   : > { %391 = vst.msk [vmem:[%s593_s27 + $0x26] sm:$0xff] %vm256_vm5, %v293_v30 }
 0x129   : > { %469 = shalt.err (!%p466_p3)
}
 0x12a   : > { %s508_s21 = smov 128   ;;  %s509_s22 = smov 8  }
 0x12b   : > { %399 = dma.vmem_to_hbm [thread:$0]  (%p558_p5), %s319_s3, 768, %s321_s4, %s306_s5, %s508_s21, %s508_s21, %s509_s22  }
 0x12c PF: > { %p405_p4 = scmp.ge.s32.totalorder %s504_s9, 2  ;;  %s335_s23 = sand.u32 1, %s492_s6  }
 0x12d   : > { %s336_s24 = scalar_lea.sflag [#allocation3], %s335_s23 }
 0x12e   : > { %p402_p7 = pnand %p405_p4, %p562_p6 }
 0x130   : > { %p403_p8 = pneg %p402_p7 }
 0x132   : > { %487 = dma.done.wait (%p403_p8), %s336_s24, 768  }
 0x133   : > { %489 = vsyncadd (%p403_p8), %s336_s24, 4294966528  ;;  %p11_p9 = scmp.ge.s32.totalorder %s545_s12, 4   ;;  %s651_s6 = smov %s496_s7 }
 0x134   : > { %s652_s7 = smov %s500_s8  ;;  %s653_s8 = smov %s556_s15 }
 0x135   : > { %s654_s9 = smov %s545_s12  ;;  %13 = sbr.rel (!%p11_p9) target bundleno = 3 (0x3), region = 61 }
 0x13a   :  { %342 = vsyncpa [#allocation3], 1 }
 0x13b   :  { %344 = vsyncpa [#allocation3 + $0x1], 1 }

</bundles_post_ra>
